<compile_context>
chip_gen: v7x
topology: tpu7x:2x2x1
jax: 0.10.0
libtpu: 0.0.40
codegen_flags: <defaults>
</compile_context>

<pallas_src>
import jax
import jax.numpy as jnp
from jax.experimental import pallas as pl
from jax.experimental.pallas import tpu as pltpu


def _hbm_copy_kernel(x_hbm, o_hbm, sem):
    # Whole-buffer HBM -> HBM DMA.  No VMEM staging, no vector load/store
    # slots, no per-grid-step overhead.
    cp = pltpu.make_async_copy(x_hbm, o_hbm, sem)
    cp.start()
    cp.wait()


def _pallas_materialize(x):
    """Materialize `x` into a fresh HBM buffer via a direct HBM->HBM DMA."""
    if x.ndim == 0 or x.size == 0:
        # Scalars / empty arrays: nothing worth putting through a kernel.
        return x

    # TODO(synk): 64-bit dtypes (jax_enable_x64) are not native TPU vector
    # dtypes; the raw DMA copy is expected to handle them, but they are
    # untested here.
    itemsize = jnp.dtype(x.dtype).itemsize
    return pl.pallas_call(
        _hbm_copy_kernel,
        out_shape=jax.ShapeDtypeStruct(x.shape, x.dtype),
        in_specs=[pl.BlockSpec(memory_space=pl.ANY)],
        out_specs=pl.BlockSpec(memory_space=pl.ANY),
        scratch_shapes=[pltpu.SemaphoreType.DMA(())],
        # Pure memory traffic — read everything once, write everything once.
        cost_estimate=pl.CostEstimate(
            flops=0,
            transcendentals=0,
            bytes_accessed=2 * x.size * itemsize,
        ),
    )(x)


class GetItem:
    """JAX/Pallas equivalent of schnetpack.nn.base.GetItem.

    forward(inputs) -> inputs[key].

    materialize=False (default): zero-copy — returns the array directly, which
    is the optimal implementation on every TPU generation (zero bytes moved).
    materialize=True: copies the array into a fresh buffer with a single
    HBM->HBM DMA Pallas kernel (same shape, dtype, and values).
    """

    def __init__(self, key, materialize=False):
        self.key = key
        self.materialize = materialize

    def __call__(self, inputs):
        x = inputs[self.key]
        if not self.materialize:
            return x  # GetItem is a semantic no-op: best kernel is no kernel.
        return _pallas_materialize(x)


if __name__ == "__main__":
    key = jax.random.PRNGKey(0)
    k1, k2, k3, k4 = jax.random.split(key, 4)

    # Small SchNetPack-style input dictionary.
    B, A, F = 2, 8, 32  # batch, atoms, features
    inputs = {
        "representation": jax.random.normal(k1, (B, A, F), dtype=jnp.float32),
        "_positions": jax.random.normal(k2, (B, A, 3), dtype=jnp.float32),
        "_atomic_numbers": jax.random.randint(k3, (B, A), 1, 10, dtype=jnp.int32),
        # Larger packed-dtype entry to exercise the DMA path on a non-trivial
        # size (8*128*128 bf16 = 256 KiB).
        "embeddings_bf16": jax.random.normal(k4, (8, 128, 128), dtype=jnp.bfloat16),
    }

    # 1) Default zero-copy path (the true optimum for GetItem).
    out_fast = GetItem("representation")(inputs)
    jax.block_until_ready(out_fast)
    assert out_fast.shape == inputs["representation"].shape
    assert out_fast.dtype == inputs["representation"].dtype
    assert bool(jnp.all(out_fast == inputs["representation"]))

    # 2) Materializing Pallas path — exact identity for several keys/dtypes,
    #    including arbitrary (non 8x128-aligned) shapes like (2, 8, 3).
    for k in ("representation", "_positions", "_atomic_numbers", "embeddings_bf16"):
        layer = GetItem(k, materialize=True)
        out = layer(inputs)
        jax.block_until_ready(out)
        assert out.shape == inputs[k].shape, (k, out.shape, inputs[k].shape)
        assert out.dtype == inputs[k].dtype, (k, out.dtype, inputs[k].dtype)
        assert bool(jnp.all(out == inputs[k])), k

    print("KERNEL_OK")
</pallas_src>

<mosaic_0001>
module attributes {stable_mosaic.version = 11 : i64} {
  func.func @_hbm_copy_kernel(%arg0: memref<2x8x32xf32, #tpu.memory_space<any>>, %arg1: memref<2x8x32xf32, #tpu.memory_space<any>>, %arg2: memref<!tpu.dma_semaphore, #tpu.memory_space<semaphore_mem>>) attributes {dimension_semantics = [], scalar_prefetch = 0 : i64, scratch_operands = 1 : i64, tpu.core_type = #tpu.core_type<tc>} {
    tpu.enqueue_dma source(%arg0 : memref<2x8x32xf32, #tpu.memory_space<any>>) target(%arg1 : memref<2x8x32xf32, #tpu.memory_space<any>>) target_semaphore(%arg2 : memref<!tpu.dma_semaphore, #tpu.memory_space<semaphore_mem>>)
    tpu.wait_dma2 semaphore(%arg2 : memref<!tpu.dma_semaphore, #tpu.memory_space<semaphore_mem>>) src(%arg0 : memref<2x8x32xf32, #tpu.memory_space<any>>) dst(%arg1 : memref<2x8x32xf32, #tpu.memory_space<any>>)
    return
  }
}

</mosaic_0001>

<bundles_post_ra>
// kernel: tpu_custom_call.1
= control target key start
LH: loop header
LB: loop body
LE: loop exit
PB: predicated region body
PF: predicated region fallthrough
CT: control target
= control target key end

     0   :  { %s35_s6 = smov [#allocation2]   ;;  %s36_s7 = smov [#allocation3]   ;;  %s54_s0 = inlined_call_operand.hbm [shape: f32[2,8,32], index: 0, kind: input, shape index: {}]   ;;  %s55_s1 = inlined_call_operand.hbm [shape: f32[2,8,32], index: 1, kind: output, shape index: {}]  }
   0x1   :  { %s37_s8 = smov 0  }
   0x2   :  { %18 = dma.general %s54_s0, 256, %s55_s1, %s35_s6, %s36_s7, [#allocation4], %s37_s8, 0  }
   0x3   :  { %33 = dma.done.wait [#allocation2], 256 }
   0x4   :  { %34 = vsyncadd [#allocation2], 4294967040 }
   0x5   :  { %23 = vsyncmov [#allocation2] }
   0x8   :  { %s24_s13 = vpop.sfrf %23 }
   0x9   :  { %p29_p0 = scmp.ne.s32.totalorder %s24_s13, 0 }
   0xb   :  { %28 = shalt.err (%p29_p0)  }

</bundles_post_ra>
